<compile_context>
chip_gen: v7x
topology: tpu7x:2x2x1
jax: 0.10.0
libtpu: 0.0.40
codegen_flags: <defaults>
</compile_context>

<pallas_src>
import jax
import jax.numpy as jnp
from jax.experimental import pallas as pl
from jax.experimental.pallas import tpu as pltpu

HIDDEN = 512
NUM_CLASSES = 10
OUT_PAD = 128          # final output dim padded to a lane-dense multiple of 128
TB_MAX = 512           # max batch tile (MXU M dim); multiple of 32
SUBLANE_BF16 = 16      # bf16 packs 16 rows per vreg sublane group
SPLIT_THRESH = 256     # below this, one grid step (per-step overhead dominates)


def _round_up(n, m):
    return ((n + m - 1) // m) * m


def _make_classifier_kernel(tb, n_chunks):
    """Fused Dropout(eval)->Linear(512,512)->ReLU->Dropout(eval)->Linear(512,512)
    ->ReLU->Linear(512,10 padded to 128).

    The batch tile is split into `n_chunks` independent row chunks, each run through
    the full 3-layer chain as straight-line code, so chunk-k's matmuls can overlap
    chunk-(k-1)'s bias/ReLU/cast (VPU) epilogue and MRF drain.
    """
    assert tb % n_chunks == 0
    chunk = tb // n_chunks

    def kernel(x_ref, w1_ref, b1_ref, w2_ref, b2_ref, w3_ref, b3_ref, out_ref):
        for c in range(n_chunks):                      # static unroll: independent chains
            rows = slice(c * chunk, (c + 1) * chunk)   # aligned (chunk % 16 == 0 when split)
            x = x_ref[rows, :]                         # already bf16 (cast done wrapper-side)
            h1 = jnp.dot(x, w1_ref[...],
                         preferred_element_type=jnp.float32) + b1_ref[...]
            h1 = jnp.maximum(h1, 0.0).astype(jnp.bfloat16)   # f32 epilogue, cast only for MXU
            h2 = jnp.dot(h1, w2_ref[...],
                         preferred_element_type=jnp.float32) + b2_ref[...]
            h2 = jnp.maximum(h2, 0.0).astype(jnp.bfloat16)
            out_ref[rows, :] = (
                jnp.dot(h2, w3_ref[...], preferred_element_type=jnp.float32)
                + b3_ref[...]
            )

    return kernel


@jax.jit
def vgg_forward(x_nchw, prepped_params):
    """Reproduces VGG.forward: returns (x_flat, x_final).

    x_nchw: [B, 512, 1, 1] float32 (output of `features`, identity here).
    prepped_params: output of prepare_params() — pre-transposed/padded/bf16.
    """
    B = x_nchw.shape[0]
    x_flat = x_nchw.reshape(B, -1)            # == x.view(x.size(0), -1), returned as-is
    assert x_flat.shape[1] == HIDDEN

    w1_t, b1_r, w2_t, b2_r, w3_t, b3_r = prepped_params

    # --- batch tiling -----------------------------------------------------
    # Pad only to the bf16 sublane multiple; the grid handles a partial last block.
    b_pad = _round_up(B, SUBLANE_BF16)
    if b_pad < SPLIT_THRESH:
        tb = b_pad                            # tiny batch: one grid step
    else:
        # at least 2 grid steps (v7x: 2 TensorCores), tile a multiple of 32, cap TB_MAX
        tb = min(TB_MAX, _round_up(pl.cdiv(b_pad, 2), 32))
    grid = pl.cdiv(b_pad, tb)
    n_chunks = 2 if (tb >= 128 and tb % 32 == 0) else 1

    # --- wrapper-side cast + (minimal) pad, fused: only pad rows are written ----
    x_bf16 = x_flat.astype(jnp.bfloat16)
    if b_pad != B:
        x_in = jnp.pad(x_bf16, ((0, b_pad - B), (0, 0)))
    else:
        x_in = x_bf16

    weight_bytes = (w1_t.size + w2_t.size + w3_t.size) * 2 \
                 + (b1_r.size + b2_r.size + b3_r.size) * 4
    cost = pl.CostEstimate(
        flops=2 * grid * tb * HIDDEN * (HIDDEN + HIDDEN + OUT_PAD),
        transcendentals=0,
        bytes_accessed=weight_bytes + b_pad * HIDDEN * 2 + b_pad * OUT_PAD * 4,
    )

    out_padded = pl.pallas_call(
        _make_classifier_kernel(tb, n_chunks),
        out_shape=jax.ShapeDtypeStruct((b_pad, OUT_PAD), jnp.float32),
        grid_spec=pltpu.PrefetchScalarGridSpec(
            num_scalar_prefetch=0,
            grid=(grid,),
            in_specs=[
                pl.BlockSpec((tb, HIDDEN), lambda i: (i, 0)),        # x tile (bf16)
                pl.BlockSpec((HIDDEN, HIDDEN), lambda i: (0, 0)),    # w1 (VMEM-resident)
                pl.BlockSpec((1, HIDDEN), lambda i: (0, 0)),         # b1
                pl.BlockSpec((HIDDEN, HIDDEN), lambda i: (0, 0)),    # w2 (VMEM-resident)
                pl.BlockSpec((1, HIDDEN), lambda i: (0, 0)),         # b2
                pl.BlockSpec((HIDDEN, OUT_PAD), lambda i: (0, 0)),   # w3 (VMEM-resident)
                pl.BlockSpec((1, OUT_PAD), lambda i: (0, 0)),        # b3
            ],
            out_specs=pl.BlockSpec((tb, OUT_PAD), lambda i: (i, 0)),
        ),
        compiler_params=pltpu.CompilerParams(
            dimension_semantics=("parallel",),    # batch tiles are independent
            vmem_limit_bytes=32 << 20,            # covers TB=512 on v5e's 16 MiB default
        ),
        cost_estimate=cost,
    )(x_in, w1_t, b1_r, w2_t, b2_r, w3_t, b3_r)

    x_final = out_padded[:B, :NUM_CLASSES]
    return x_flat, x_final


def init_params(key):
    """PyTorch-style nn.Linear default init U(-1/sqrt(fan_in), +), f32, [out, in]."""
    ks = jax.random.split(key, 6)
    bound = 1.0 / jnp.sqrt(jnp.float32(HIDDEN))
    w1 = jax.random.uniform(ks[0], (HIDDEN, HIDDEN), jnp.float32, -bound, bound)
    b1 = jax.random.uniform(ks[1], (HIDDEN,), jnp.float32, -bound, bound)
    w2 = jax.random.uniform(ks[2], (HIDDEN, HIDDEN), jnp.float32, -bound, bound)
    b2 = jax.random.uniform(ks[3], (HIDDEN,), jnp.float32, -bound, bound)
    w3 = jax.random.uniform(ks[4], (NUM_CLASSES, HIDDEN), jnp.float32, -bound, bound)
    b3 = jax.random.uniform(ks[5], (NUM_CLASSES,), jnp.float32, -bound, bound)
    return (w1, b1, w2, b2, w3, b3)


def prepare_params(params):
    """One-time preprocessing (NOT per forward call): transpose to [in,out],
    pad last layer to 128 lanes, cast weights to bf16; biases stay f32."""
    w1, b1, w2, b2, w3, b3 = params
    w1_t = w1.T.astype(jnp.bfloat16)                                  # [512, 512]
    w2_t = w2.T.astype(jnp.bfloat16)                                  # [512, 512]
    w3_t = jnp.zeros((HIDDEN, OUT_PAD), jnp.bfloat16).at[:, :NUM_CLASSES].set(
        w3.T.astype(jnp.bfloat16))                                    # [512, 128]
    b1_r = b1.reshape(1, HIDDEN)
    b2_r = b2.reshape(1, HIDDEN)
    b3_r = jnp.zeros((1, OUT_PAD), jnp.float32).at[0, :NUM_CLASSES].set(b3)
    return (w1_t, b1_r, w2_t, b2_r, w3_t, b3_r)


if __name__ == "__main__":
    key = jax.random.PRNGKey(0)
    k_x, k_p = jax.random.split(key)

    B = 2
    # Post-features activation for a CIFAR VGG: [B, 512, 1, 1] (NCHW).
    x = jax.random.normal(k_x, (B, HIDDEN, 1, 1), jnp.float32)
    params = init_params(k_p)
    prepped = prepare_params(params)   # done once, outside the forward path

    x_flat, x_final = vgg_forward(x, prepped)
    jax.block_until_ready((x_flat, x_final))

    # Pure-JAX f32 reference of the classifier math (bf16 weights -> loose tol).
    w1, b1, w2, b2, w3, b3 = params
    xr = x.reshape(B, -1)
    h = jnp.maximum(xr @ w1.T + b1, 0.0)
    h = jnp.maximum(h @ w2.T + b2, 0.0)
    ref = h @ w3.T + b3
    assert x_flat.shape == (B, HIDDEN)
    assert x_final.shape == (B, NUM_CLASSES)
    assert jnp.allclose(x_flat, xr)
    assert jnp.allclose(x_final, ref, atol=5e-2, rtol=5e-2)

    print("KERNEL_OK")
</pallas_src>

<mosaic_0001>
module attributes {stable_mosaic.version = 11 : i64} {
  func.func @kernel(%arg0: i32, %arg1: memref<16x512xbf16, #tpu.memory_space<vmem>>, %arg2: memref<512x512xbf16, #tpu.memory_space<vmem>>, %arg3: memref<1x512xf32, #tpu.memory_space<vmem>>, %arg4: memref<512x512xbf16, #tpu.memory_space<vmem>>, %arg5: memref<1x512xf32, #tpu.memory_space<vmem>>, %arg6: memref<512x128xbf16, #tpu.memory_space<vmem>>, %arg7: memref<1x128xf32, #tpu.memory_space<vmem>>, %arg8: memref<16x128xf32, #tpu.memory_space<vmem>>) attributes {dimension_semantics = [#tpu.dimension_semantics<parallel>], iteration_bounds = array<i64: 1>, scalar_prefetch = 0 : i64, scratch_operands = 0 : i64, tpu.core_type = #tpu.core_type<tc>, window_params = [{transform_indices = @transform_0, window_bounds = array<i64: 16, 512>}, {pipeline_mode = #tpu.pipeline_mode<synchronous>, transform_indices = @transform_1, window_bounds = array<i64: 512, 512>}, {pipeline_mode = #tpu.pipeline_mode<synchronous>, transform_indices = @transform_2, window_bounds = array<i64: 1, 512>}, {pipeline_mode = #tpu.pipeline_mode<synchronous>, transform_indices = @transform_3, window_bounds = array<i64: 512, 512>}, {pipeline_mode = #tpu.pipeline_mode<synchronous>, transform_indices = @transform_4, window_bounds = array<i64: 1, 512>}, {pipeline_mode = #tpu.pipeline_mode<synchronous>, transform_indices = @transform_5, window_bounds = array<i64: 512, 128>}, {pipeline_mode = #tpu.pipeline_mode<synchronous>, transform_indices = @transform_6, window_bounds = array<i64: 1, 128>}, {transform_indices = @transform_7, window_bounds = array<i64: 16, 128>}]} {
    %c0 = arith.constant 0 : index
    %c0_0 = arith.constant 0 : index
    %0 = vector.load %arg1[%c0, %c0_0] : memref<16x512xbf16, #tpu.memory_space<vmem>>, vector<16x512xbf16>
    %c0_1 = arith.constant 0 : index
    %c0_2 = arith.constant 0 : index
    %1 = vector.load %arg2[%c0_1, %c0_2] : memref<512x512xbf16, #tpu.memory_space<vmem>>, vector<512x512xbf16>
    %cst = arith.constant dense<0.000000e+00> : vector<16x512xf32>
    %2 = tpu.matmul %0, %1, %cst {dimension_numbers = #tpu.dot_dimension_numbers<[1], [0], [0], [1], [0, 0, 1, 1], [], []>} : vector<16x512xbf16>, vector<512x512xbf16>, vector<16x512xf32> -> vector<16x512xf32>
    %c0_3 = arith.constant 0 : index
    %c0_4 = arith.constant 0 : index
    %3 = vector.load %arg3[%c0_3, %c0_4] : memref<1x512xf32, #tpu.memory_space<vmem>>, vector<1x512xf32>
    %4 = vector.broadcast %3 : vector<1x512xf32> to vector<16x512xf32>
    %5 = arith.addf %2, %4 : vector<16x512xf32>
    %cst_5 = arith.constant 0.000000e+00 : f32
    %6 = vector.broadcast %cst_5 : f32 to vector<16x512xf32>
    %7 = arith.maximumf %5, %6 : vector<16x512xf32>
    %8 = arith.truncf %7 : vector<16x512xf32> to vector<16x512xbf16>
    %c0_6 = arith.constant 0 : index
    %c0_7 = arith.constant 0 : index
    %9 = vector.load %arg4[%c0_6, %c0_7] : memref<512x512xbf16, #tpu.memory_space<vmem>>, vector<512x512xbf16>
    %cst_8 = arith.constant dense<0.000000e+00> : vector<16x512xf32>
    %10 = tpu.matmul %8, %9, %cst_8 {dimension_numbers = #tpu.dot_dimension_numbers<[1], [0], [0], [1], [0, 0, 1, 1], [], []>} : vector<16x512xbf16>, vector<512x512xbf16>, vector<16x512xf32> -> vector<16x512xf32>
    %c0_9 = arith.constant 0 : index
    %c0_10 = arith.constant 0 : index
    %11 = vector.load %arg5[%c0_9, %c0_10] : memref<1x512xf32, #tpu.memory_space<vmem>>, vector<1x512xf32>
    %12 = vector.broadcast %11 : vector<1x512xf32> to vector<16x512xf32>
    %13 = arith.addf %10, %12 : vector<16x512xf32>
    %cst_11 = arith.constant 0.000000e+00 : f32
    %14 = vector.broadcast %cst_11 : f32 to vector<16x512xf32>
    %15 = arith.maximumf %13, %14 : vector<16x512xf32>
    %16 = arith.truncf %15 : vector<16x512xf32> to vector<16x512xbf16>
    %c0_12 = arith.constant 0 : index
    %c0_13 = arith.constant 0 : index
    %17 = vector.load %arg6[%c0_12, %c0_13] : memref<512x128xbf16, #tpu.memory_space<vmem>>, vector<512x128xbf16>
    %cst_14 = arith.constant dense<0.000000e+00> : vector<16x128xf32>
    %18 = tpu.matmul %16, %17, %cst_14 {dimension_numbers = #tpu.dot_dimension_numbers<[1], [0], [0], [1], [0, 0, 1, 1], [], []>} : vector<16x512xbf16>, vector<512x128xbf16>, vector<16x128xf32> -> vector<16x128xf32>
    %c0_15 = arith.constant 0 : index
    %c0_16 = arith.constant 0 : index
    %19 = vector.load %arg7[%c0_15, %c0_16] : memref<1x128xf32, #tpu.memory_space<vmem>>, vector<1x128xf32>
    %20 = vector.broadcast %19 : vector<1x128xf32> to vector<16x128xf32>
    %21 = arith.addf %18, %20 : vector<16x128xf32>
    %c0_17 = arith.constant 0 : index
    %c0_18 = arith.constant 0 : index
    %22 = vector.load %arg8[%c0_17, %c0_18] : memref<16x128xf32, #tpu.memory_space<vmem>>, vector<16x128xf32>
    tpu.vector_store %arg8[%c0_17, %c0_18], %21 {strides = array<i32>} : memref<16x128xf32, #tpu.memory_space<vmem>>, vector<16x128xf32>,
    return
  }
  func.func @transform_0(%arg0: i32) -> (i32, i32) {
    %c0_i32 = arith.constant 0 : i32
    %c0_i32_0 = arith.constant 0 : i32
    return %arg0, %c0_i32 : i32, i32
  }
  func.func @transform_1(%arg0: i32) -> (i32, i32) {
    %c0_i32 = arith.constant 0 : i32
    %c0_i32_0 = arith.constant 0 : i32
    %c0_i32_1 = arith.constant 0 : i32
    return %c0_i32, %c0_i32_0 : i32, i32
  }
  func.func @transform_2(%arg0: i32) -> (i32, i32) {
    %c0_i32 = arith.constant 0 : i32
    %c0_i32_0 = arith.constant 0 : i32
    %c0_i32_1 = arith.constant 0 : i32
    return %c0_i32, %c0_i32_0 : i32, i32
  }
  func.func @transform_3(%arg0: i32) -> (i32, i32) {
    %c0_i32 = arith.constant 0 : i32
    %c0_i32_0 = arith.constant 0 : i32
    %c0_i32_1 = arith.constant 0 : i32
    return %c0_i32, %c0_i32_0 : i32, i32
  }
  func.func @transform_4(%arg0: i32) -> (i32, i32) {
    %c0_i32 = arith.constant 0 : i32
    %c0_i32_0 = arith.constant 0 : i32
    %c0_i32_1 = arith.constant 0 : i32
    return %c0_i32, %c0_i32_0 : i32, i32
  }
  func.func @transform_5(%arg0: i32) -> (i32, i32) {
    %c0_i32 = arith.constant 0 : i32
    %c0_i32_0 = arith.constant 0 : i32
    %c0_i32_1 = arith.constant 0 : i32
    return %c0_i32, %c0_i32_0 : i32, i32
  }
  func.func @transform_6(%arg0: i32) -> (i32, i32) {
    %c0_i32 = arith.constant 0 : i32
    %c0_i32_0 = arith.constant 0 : i32
    %c0_i32_1 = arith.constant 0 : i32
    return %c0_i32, %c0_i32_0 : i32, i32
  }
  func.func @transform_7(%arg0: i32) -> (i32, i32) {
    %c0_i32 = arith.constant 0 : i32
    %c0_i32_0 = arith.constant 0 : i32
    return %arg0, %c0_i32 : i32, i32
  }
}

</mosaic_0001>

<bundles_post_ra>
// kernel: vgg_forward.1
= control target key start
LH: loop header
LB: loop body
LE: loop exit
PB: predicated region body
PF: predicated region fallthrough
CT: control target
= control target key end

     0   :  { %12 = vsyncpa [#allocation3], 0  ;;  %s3404_s0 = inlined_call_operand.vmem [shape: bf16[16,512], index: 0, kind: input, shape index: {}]   ;;  %s3405_s1 = inlined_call_operand.hbm [shape: bf16[512,512], index: 1, kind: input, shape index: {}]   ;;  %s3406_s2 = inlined_call_operand.vmem [shape: f32[1,512], index: 2, kind: input, shape index: {}]   ;;  %s3407_s3 = inlined_call_operand.hbm [shape: bf16[512,512], index: 3, kind: input, shape index: {}]   ;;  %s3408_s4 = inlined_call_operand.vmem [shape: f32[1,512], index: 4, kind: input, shape index: {}]   ;;  %s3409_s5 = inlined_call_operand.hbm [shape: bf16[512,128], index: 5, kind: input, shape index: {}]   ;;  %s3410_s6 = inlined_call_operand.vmem [shape: f32[1,128], index: 6, kind: input, shape index: {}]   ;;  %s3411_s7 = inlined_call_operand.vmem [shape: f32[16,128], index: 7, kind: output, shape index: {}]  }
   0x1   :  { %13 = vsyncpa [#allocation5], 0  ;;  %s3261_s24 = smov [#allocation4]   ;;  %s3262_s26 = smov [#allocation2]  }
   0x2   :  { %s35_s25 = sshll.u32 %s3261_s24, 4  ;;  %s21_s27 = sshll.u32 %s3262_s26, 4  ;;  %s36_s25 = int_to_ptr.vmem [resolvable:$true] %s35_s25  ;;  %s3308_s27 = int_to_ptr.vmem [resolvable:$true] %s21_s27 }
   0x3   :  { %s3191_s30 = scalar_lea.hbm %s3407_s3, 16384 }
   0x4   :  { %p3192_p0 = scmp.ne.s32.totalorder %s3407_s3, %s3191_s30  ;;  %p3195_p1 = scmp.lt.u32.totalorder %s3191_s30, %s3407_s3 }
   0x6   :  { %p3197_p2 = pnand %p3195_p1, %p3192_p0 }
   0x8   :  { %3200 = shalt.err (!%p3197_p2)
}
   0x9   :  { %s3201_s12 = scalar_lea.vmem %s36_s25, 16384  ;;  %p3206_p4 = scmp.lt.s32.totalorder %s36_s25, %s36_s25 }
   0xa   :  { %p3202_p3 = scmp.ne.s32.totalorder %s36_s25, %s3201_s12  ;;  %p3207_p5 = scmp.lt.s32.totalorder %s3201_s12, %s3201_s12 }
   0xc   :  { %p3208_p6 = por %p3207_p5, %p3206_p4 }
   0xe   :  { %p3209_p7 = pnand %p3208_p6, %p3202_p3 }
  0x10   :  { %3212 = shalt.err (!%p3209_p7)
}
  0x11   :  { %s3263_s13 = smov 256   ;;  %s3264_s14 = smov 16  }
  0x12   :  { %41 = dma.hbm_to_vmem [thread:$0]  %s3407_s3, 16384, %s36_s25, [#allocation5], %s3263_s13, %s3263_s13, %s3264_s14  }
  0x13   :  { %s3213_s19 = scalar_lea.hbm %s3405_s1, 16384 }
  0x14   :  { %p3214_p8 = scmp.ne.s32.totalorder %s3405_s1, %s3213_s19  ;;  %p3217_p9 = scmp.lt.u32.totalorder %s3213_s19, %s3405_s1 }
  0x16   :  { %p3219_p10 = pnand %p3217_p9, %p3214_p8 }
  0x18   :  { %3222 = shalt.err (!%p3219_p10)
}
  0x19   :  { %s3223_s24 = scalar_lea.vmem %s3308_s27, 16384  ;;  %p3228_p12 = scmp.lt.s32.totalorder %s3308_s27, %s3308_s27 }
  0x1a   :  { %p3224_p11 = scmp.ne.s32.totalorder %s3308_s27, %s3223_s24  ;;  %p3229_p13 = scmp.lt.s32.totalorder %s3223_s24, %s3223_s24 }
  0x1c   :  { %p3230_p0 = por %p3229_p13, %p3228_p12 }
  0x1e   :  { %p3231_p1 = pnand %p3230_p0, %p3224_p11 }
  0x20   :  { %3234 = shalt.err (!%p3231_p1)
}
  0x21   :  { %27 = dma.hbm_to_vmem [thread:$0]  %s3405_s1, 16384, %s3308_s27, [#allocation3], %s3263_s13, %s3263_s13, %s3264_s14  }
  0x22   :  { %s3265_s26 = smov [#allocation6]   ;;  %s3235_s8 = scalar_lea.hbm %s3409_s5, 4096 }
  0x23   :  { %s49_s28 = sshll.u32 %s3265_s26, 4  ;;  %p3236_p2 = scmp.ne.s32.totalorder %s3409_s5, %s3235_s8  ;;  %s50_s28 = int_to_ptr.vmem [resolvable:$true] %s49_s28 }
  0x24   :  { %p3239_p3 = scmp.lt.u32.totalorder %s3235_s8, %s3409_s5 }
  0x26   :  { %p3241_p4 = pnand %p3239_p3, %p3236_p2 }
  0x28   :  { %3244 = shalt.err (!%p3241_p4)
}
  0x29   :  { %s3245_s15 = scalar_lea.vmem %s50_s28, 4096  ;;  %p3250_p6 = scmp.lt.s32.totalorder %s50_s28, %s50_s28 }
  0x2a   :  { %p3246_p5 = scmp.ne.s32.totalorder %s50_s28, %s3245_s15  ;;  %p3251_p7 = scmp.lt.s32.totalorder %s3245_s15, %s3245_s15 }
  0x2c   :  { %p3252_p8 = por %p3251_p7, %p3250_p6 }
  0x2e   :  { %p3253_p9 = pnand %p3252_p8, %p3246_p5 }
  0x30   :  { %3256 = shalt.err (!%p3253_p9)
}
  0x31   :  { %s3266_s1 = smov 64   ;;  %s3267_s27 = smov 4  }
  0x32   :  { %55 = dma.hbm_to_vmem [thread:$0]  %s3409_s5, 4096, %s50_s28, [#allocation5], %s3266_s1, %s3266_s1, %s3267_s27  }
  0x33   :  { %3257 = dma.done.wait [#allocation3], 16384  }
  0x34   :  { %3258 = vsyncadd [#allocation3], 4294950912 }
  0x35   :  { %3259 = dma.done.wait [#allocation5], 20480  }
  0x36   :  { %3260 = vsyncadd [#allocation5], 4294946816  ;;  %v2769_v0 = vld [vmem:[#allocation2 + $0x4] ss:$16 sps:$4 sm:$0xff]   ;;  %v2771_v1 = vld [vmem:[#allocation2 + $0xc] ss:$16 sps:$4 sm:$0xff]  }
  0x37   :  { %882 = vmatprep.subr.bf16.mxu0 %v2769_v0  ;;  %v2773_v2 = vld [vmem:[#allocation2] ss:$16 sps:$4 sm:$0xff]   ;;  %v2774_v3 = vld [vmem:[#allocation2 + $0x8] ss:$16 sps:$4 sm:$0xff]   ;;  %968 = vmatprep.subr.bf16.mxu1 %v2771_v1  ;;  %v2775_v4 = vld [vmem:[#allocation2 + $0x24] ss:$16 sps:$4 sm:$0xff]  }
  0x38   :  { %883 = vmatpush1.bf16.msra.mxu0 %v2773_v2  ;;  %969 = vmatpush1.bf16.msra.mxu1 %v2774_v3  ;;  %v2777_v5 = vld [vmem:[#allocation2 + $0x2c] ss:$16 sps:$4 sm:$0xff]   ;;  %v2779_v6 = vld [vmem:[#allocation2 + $0x20] ss:$16 sps:$4 sm:$0xff]   ;;  %v2780_v7 = vld [vmem:[#allocation2 + $0x28] ss:$16 sps:$4 sm:$0xff]  }
  0x39   :  { %884 = vmatprep.subr.bf16.mxu0 %v2775_v4  ;;  %970 = vmatprep.subr.bf16.mxu1 %v2777_v5  ;;  %v2781_v8 = vld [vmem:[#allocation2 + $0x44] ss:$16 sps:$4 sm:$0xff]   ;;  %v2783_v9 = vld [vmem:[#allocation2 + $0x4c] ss:$16 sps:$4 sm:$0xff]   ;;  %v2785_v10 = vld [vmem:[#allocation2 + $0x40] ss:$16 sps:$4 sm:$0xff]  }
  0x3a   :  { %v2786_v11 = vld [vmem:[#allocation2 + $0x48] ss:$16 sps:$4 sm:$0xff]   ;;  %v2787_v12 = vld [vmem:[#allocation2 + $0x64] ss:$16 sps:$4 sm:$0xff]   ;;  %v2789_v13 = vld [vmem:[#allocation2 + $0x6c] ss:$16 sps:$4 sm:$0xff]  }
  0x3b   :  { %v2791_v14 = vld [vmem:[#allocation2 + $0x60] ss:$16 sps:$4 sm:$0xff]   ;;  %v2792_v15 = vld [vmem:[#allocation2 + $0x68] ss:$16 sps:$4 sm:$0xff]   ;;  %v2793_v16 = vld [vmem:[#allocation2 + $0x84] ss:$16 sps:$4 sm:$0xff]  }
  0x3c   :  { %885 = vmatpush1.bf16.msra.mxu0 %v2779_v6  ;;  %971 = vmatpush1.bf16.msra.mxu1 %v2780_v7  ;;  %v2795_v17 = vld [vmem:[#allocation2 + $0x8c] ss:$16 sps:$4 sm:$0xff]   ;;  %v2797_v18 = vld [vmem:[#allocation2 + $0x80] ss:$16 sps:$4 sm:$0xff]   ;;  %v2798_v19 = vld [vmem:[#allocation2 + $0x88] ss:$16 sps:$4 sm:$0xff]  }
  0x3d   :  { %886 = vmatprep.subr.bf16.mxu0 %v2781_v8  ;;  %972 = vmatprep.subr.bf16.mxu1 %v2783_v9  ;;  %v2799_v20 = vld [vmem:[#allocation2 + $0xa4] ss:$16 sps:$4 sm:$0xff]   ;;  %v2801_v21 = vld [vmem:[#allocation2 + $0xac] ss:$16 sps:$4 sm:$0xff]   ;;  %v2803_v22 = vld [vmem:[#allocation2 + $0xa0] ss:$16 sps:$4 sm:$0xff]  }
  0x3e   :  { %v2804_v23 = vld [vmem:[#allocation2 + $0xa8] ss:$16 sps:$4 sm:$0xff]   ;;  %v2805_v24 = vld [vmem:[#allocation2 + $0xc4] ss:$16 sps:$4 sm:$0xff]   ;;  %v2807_v25 = vld [vmem:[#allocation2 + $0xcc] ss:$16 sps:$4 sm:$0xff]  }
  0x3f   :  { %v2809_v26 = vld [vmem:[#allocation2 + $0xc0] ss:$16 sps:$4 sm:$0xff]   ;;  %v2810_v27 = vld [vmem:[#allocation2 + $0xc8] ss:$16 sps:$4 sm:$0xff]   ;;  %v2811_v28 = vld [vmem:[#allocation2 + $0xe4] ss:$16 sps:$4 sm:$0xff]  }
  0x40   :  { %887 = vmatpush1.bf16.msra.mxu0 %v2785_v10  ;;  %973 = vmatpush1.bf16.msra.mxu1 %v2786_v11  ;;  %v2813_v29 = vld [vmem:[#allocation2 + $0xec] ss:$16 sps:$4 sm:$0xff]   ;;  %v2815_v30 = vld [vmem:[#allocation2 + $0xe0] ss:$16 sps:$4 sm:$0xff]   ;;  %v2816_v31 = vld [vmem:[#allocation2 + $0xe8] ss:$16 sps:$4 sm:$0xff]  }
  0x41   :  { %888 = vmatprep.subr.bf16.mxu0 %v2787_v12  ;;  %974 = vmatprep.subr.bf16.mxu1 %v2789_v13  ;;  %v2817_v32 = vld [vmem:[#allocation2 + $0x104] ss:$16 sps:$4 sm:$0xff]   ;;  %v2819_v33 = vld [vmem:[#allocation2 + $0x10c] ss:$16 sps:$4 sm:$0xff]   ;;  %v2821_v34 = vld [vmem:[#allocation2 + $0x100] ss:$16 sps:$4 sm:$0xff]  }
  0x42   :  { %v2822_v35 = vld [vmem:[#allocation2 + $0x108] ss:$16 sps:$4 sm:$0xff]   ;;  %v2823_v36 = vld [vmem:[#allocation2 + $0x124] ss:$16 sps:$4 sm:$0xff]   ;;  %v2825_v37 = vld [vmem:[#allocation2 + $0x12c] ss:$16 sps:$4 sm:$0xff]  }
  0x43   :  { %v2827_v38 = vld [vmem:[#allocation2 + $0x120] ss:$16 sps:$4 sm:$0xff]   ;;  %v2828_v39 = vld [vmem:[#allocation2 + $0x128] ss:$16 sps:$4 sm:$0xff]   ;;  %v2829_v40 = vld [vmem:[#allocation2 + $0x144] ss:$16 sps:$4 sm:$0xff]  }
  0x44   :  { %889 = vmatpush1.bf16.msra.mxu0 %v2791_v14  ;;  %975 = vmatpush1.bf16.msra.mxu1 %v2792_v15  ;;  %v2831_v41 = vld [vmem:[#allocation2 + $0x14c] ss:$16 sps:$4 sm:$0xff]   ;;  %v2833_v42 = vld [vmem:[#allocation2 + $0x140] ss:$16 sps:$4 sm:$0xff]   ;;  %v2834_v43 = vld [vmem:[#allocation2 + $0x148] ss:$16 sps:$4 sm:$0xff]  }
  0x45   :  { %890 = vmatprep.subr.bf16.mxu0 %v2793_v16  ;;  %976 = vmatprep.subr.bf16.mxu1 %v2795_v17  ;;  %v2835_v44 = vld [vmem:[#allocation2 + $0x164] ss:$16 sps:$4 sm:$0xff]   ;;  %v2837_v45 = vld [vmem:[#allocation2 + $0x16c] ss:$16 sps:$4 sm:$0xff]   ;;  %v2839_v46 = vld [vmem:[#allocation2 + $0x160] ss:$16 sps:$4 sm:$0xff]  }
  0x46   :  { %v2840_v47 = vld [vmem:[#allocation2 + $0x168] ss:$16 sps:$4 sm:$0xff]   ;;  %v2867_v48 = vld [vmem:[%s3404_s0 + $0x4] ss:$16 sps:$4 sm:$0xff]   ;;  %v2841_v49 = vld [vmem:[#allocation2 + $0x184] ss:$16 sps:$4 sm:$0xff]  }
  0x47   :  { %v2843_v50 = vld [vmem:[#allocation2 + $0x18c] ss:$16 sps:$4 sm:$0xff]   ;;  %914 = vmatprep.mubr.bf16.mxu0 %v2867_v48  ;;  %1000 = vmatprep.mubr.bf16.mxu1 %v2867_v48  ;;  %v2845_v51 = vld [vmem:[#allocation2 + $0x180] ss:$16 sps:$4 sm:$0xff]   ;;  %v2846_v52 = vld [vmem:[#allocation2 + $0x188] ss:$16 sps:$4 sm:$0xff]  }
  0x48   :  { %891 = vmatpush1.bf16.msra.mxu0 %v2797_v18  ;;  %977 = vmatpush1.bf16.msra.mxu1 %v2798_v19  ;;  %v2847_v53 = vld [vmem:[#allocation2 + $0x1a4] ss:$16 sps:$4 sm:$0xff]   ;;  %v2849_v54 = vld [vmem:[#allocation2 + $0x1ac] ss:$16 sps:$4 sm:$0xff]   ;;  %v2851_v55 = vld [vmem:[#allocation2 + $0x1a0] ss:$16 sps:$4 sm:$0xff]  }
  0x49   :  { %892 = vmatprep.subr.bf16.mxu0 %v2799_v20  ;;  %978 = vmatprep.subr.bf16.mxu1 %v2801_v21  ;;  %v2852_v56 = vld [vmem:[#allocation2 + $0x1a8] ss:$16 sps:$4 sm:$0xff]   ;;  %v2853_v57 = vld [vmem:[#allocation2 + $0x1c4] ss:$16 sps:$4 sm:$0xff]   ;;  %v2855_v58 = vld [vmem:[#allocation2 + $0x1cc] ss:$16 sps:$4 sm:$0xff]  }
  0x4a   :  { %v2857_v59 = vld [vmem:[#allocation2 + $0x1c0] ss:$16 sps:$4 sm:$0xff]   ;;  %v2858_v60 = vld [vmem:[#allocation2 + $0x1c8] ss:$16 sps:$4 sm:$0xff]   ;;  %v2859_v61 = vld [vmem:[#allocation2 + $0x1e4] ss:$16 sps:$4 sm:$0xff]  }
  0x4b   :  { %v2861_v62 = vld [vmem:[#allocation2 + $0x1ec] ss:$16 sps:$4 sm:$0xff]   ;;  %v2863_v63 = vld [vmem:[#allocation2 + $0x1e0] ss:$16 sps:$4 sm:$0xff]   ;;  %v2864_v0 = vld [vmem:[#allocation2 + $0x1e8] ss:$16 sps:$4 sm:$0xff]  }
  0x4c   :  { %893 = vmatpush1.bf16.msra.mxu0 %v2803_v22  ;;  %979 = vmatpush1.bf16.msra.mxu1 %v2804_v23  ;;  %v2870_v1 = vld [vmem:[#allocation2 + $0x204] ss:$16 sps:$4 sm:$0xff]   ;;  %v2873_v2 = vld [vmem:[#allocation2 + $0x20c] ss:$16 sps:$4 sm:$0xff]   ;;  %v2865_v3 = vld [vmem:[%s3404_s0] ss:$16 sps:$4 sm:$0xff]  }
  0x4d   :  { %894 = vmatprep.subr.bf16.mxu0 %v2805_v24  ;;  %980 = vmatprep.subr.bf16.mxu1 %v2807_v25  ;;  %v2868_v4 = vld [vmem:[#allocation2 + $0x200] ss:$16 sps:$4 sm:$0xff]   ;;  %v2871_v5 = vld [vmem:[#allocation2 + $0x208] ss:$16 sps:$4 sm:$0xff]   ;;  %v2876_v6 = vld [vmem:[#allocation2 + $0x224] ss:$16 sps:$4 sm:$0xff]  }
  0x4e   :  { %v2879_v7 = vld [vmem:[#allocation2 + $0x22c] ss:$16 sps:$4 sm:$0xff]   ;;  %v2874_v8 = vld [vmem:[#allocation2 + $0x220] ss:$16 sps:$4 sm:$0xff]   ;;  %v2877_v9 = vld [vmem:[#allocation2 + $0x228] ss:$16 sps:$4 sm:$0xff]  }
  0x4f   :  { %v2882_v10 = vld [vmem:[#allocation2 + $0x244] ss:$16 sps:$4 sm:$0xff]   ;;  %v2885_v11 = vld [vmem:[#allocation2 + $0x24c] ss:$16 sps:$4 sm:$0xff]   ;;  %v2880_v12 = vld [vmem:[#allocation2 + $0x240] ss:$16 sps:$4 sm:$0xff]  }
  0x50   :  { %895 = vmatpush1.bf16.msra.mxu0 %v2809_v26  ;;  %981 = vmatpush1.bf16.msra.mxu1 %v2810_v27  ;;  %v2883_v13 = vld [vmem:[#allocation2 + $0x248] ss:$16 sps:$4 sm:$0xff]   ;;  %v2888_v14 = vld [vmem:[#allocation2 + $0x264] ss:$16 sps:$4 sm:$0xff]   ;;  %v2891_v15 = vld [vmem:[#allocation2 + $0x26c] ss:$16 sps:$4 sm:$0xff]  }
  0x51   :  { %896 = vmatprep.subr.bf16.mxu0 %v2811_v28  ;;  %982 = vmatprep.subr.bf16.mxu1 %v2813_v29  ;;  %v2886_v16 = vld [vmem:[#allocation2 + $0x260] ss:$16 sps:$4 sm:$0xff]   ;;  %v2889_v17 = vld [vmem:[#allocation2 + $0x268] ss:$16 sps:$4 sm:$0xff]   ;;  %v2894_v18 = vld [vmem:[#allocation2 + $0x284] ss:$16 sps:$4 sm:$0xff]  }
  0x52   :  { %v2897_v19 = vld [vmem:[#allocation2 + $0x28c] ss:$16 sps:$4 sm:$0xff]   ;;  %v2892_v20 = vld [vmem:[#allocation2 + $0x280] ss:$16 sps:$4 sm:$0xff]   ;;  %v2895_v21 = vld [vmem:[#allocation2 + $0x288] ss:$16 sps:$4 sm:$0xff]  }
  0x53   :  { %v2900_v22 = vld [vmem:[#allocation2 + $0x2a4] ss:$16 sps:$4 sm:$0xff]   ;;  %v2903_v23 = vld [vmem:[#allocation2 + $0x2ac] ss:$16 sps:$4 sm:$0xff]   ;;  %v2898_v24 = vld [vmem:[#allocation2 + $0x2a0] ss:$16 sps:$4 sm:$0xff]  }
  0x54   :  { %897 = vmatpush1.bf16.msra.mxu0 %v2815_v30  ;;  %983 = vmatpush1.bf16.msra.mxu1 %v2816_v31  ;;  %v2901_v25 = vld [vmem:[#allocation2 + $0x2a8] ss:$16 sps:$4 sm:$0xff]   ;;  %v2906_v26 = vld [vmem:[#allocation2 + $0x2c4] ss:$16 sps:$4 sm:$0xff]   ;;  %v2909_v27 = vld [vmem:[#allocation2 + $0x2cc] ss:$16 sps:$4 sm:$0xff]  }
  0x55   :  { %898 = vmatprep.subr.bf16.mxu0 %v2817_v32  ;;  %984 = vmatprep.subr.bf16.mxu1 %v2819_v33  ;;  %v2904_v28 = vld [vmem:[#allocation2 + $0x2c0] ss:$16 sps:$4 sm:$0xff]   ;;  %v2907_v29 = vld [vmem:[#allocation2 + $0x2c8] ss:$16 sps:$4 sm:$0xff]   ;;  %v2966_v30 = vld [vmem:[%s3404_s0 + $0xc] ss:$16 sps:$4 sm:$0xff]  }
  0x56   :  { %v2912_v31 = vld [vmem:[#allocation2 + $0x2e4] ss:$16 sps:$4 sm:$0xff]   ;;  %v2915_v32 = vld [vmem:[#allocation2 + $0x2ec] ss:$16 sps:$4 sm:$0xff]   ;;  %v2910_v33 = vld [vmem:[#allocation2 + $0x2e0] ss:$16 sps:$4 sm:$0xff]  }
  0x57   :  { %v2939_v48 = vld [vmem:[#allocation2 + $0x36c] ss:$16 sps:$4 sm:$0xff]  }
  0x58   :  { %899 = vmatpush1.bf16.msra.mxu0 %v2821_v34  ;;  %985 = vmatpush1.bf16.msra.mxu1 %v2822_v35  ;;  %v2913_v34 = vld [vmem:[#allocation2 + $0x2e8] ss:$16 sps:$4 sm:$0xff]   ;;  %v2918_v35 = vld [vmem:[#allocation2 + $0x304] ss:$16 sps:$4 sm:$0xff]  }
  0x59   :  { %900 = vmatprep.subr.bf16.mxu0 %v2823_v36  ;;  %986 = vmatprep.subr.bf16.mxu1 %v2825_v37  ;;  %v2921_v36 = vld [vmem:[#allocation2 + $0x30c] ss:$16 sps:$4 sm:$0xff]   ;;  %v2916_v37 = vld [vmem:[#allocation2 + $0x300] ss:$16 sps:$4 sm:$0xff]  }
  0x5c   :  { %901 = vmatpush1.bf16.msra.mxu0 %v2827_v38  ;;  %987 = vmatpush1.bf16.msra.mxu1 %v2828_v39  ;;  %v2919_v38 = vld [vmem:[#allocation2 + $0x308] ss:$16 sps:$4 sm:$0xff]   ;;  %v2924_v39 = vld [vmem:[#allocation2 + $0x324] ss:$16 sps:$4 sm:$0xff]  }
  0x5d   :  { %902 = vmatprep.subr.bf16.mxu0 %v2829_v40  ;;  %988 = vmatprep.subr.bf16.mxu1 %v2831_v41  ;;  %v2927_v40 = vld [vmem:[#allocation2 + $0x32c] ss:$16 sps:$4 sm:$0xff]   ;;  %v2922_v41 = vld [vmem:[#allocation2 + $0x320] ss:$16 sps:$4 sm:$0xff]  }
  0x60   :  { %903 = vmatpush1.bf16.msra.mxu0 %v2833_v42  ;;  %989 = vmatpush1.bf16.msra.mxu1 %v2834_v43  ;;  %v2925_v42 = vld [vmem:[#allocation2 + $0x328] ss:$16 sps:$4 sm:$0xff]   ;;  %v2930_v43 = vld [vmem:[#allocation2 + $0x344] ss:$16 sps:$4 sm:$0xff]  }
  0x61   :  { %904 = vmatprep.subr.bf16.mxu0 %v2835_v44  ;;  %990 = vmatprep.subr.bf16.mxu1 %v2837_v45  ;;  %v2933_v44 = vld [vmem:[#allocation2 + $0x34c] ss:$16 sps:$4 sm:$0xff]   ;;  %v2928_v45 = vld [vmem:[#allocation2 + $0x340] ss:$16 sps:$4 sm:$0xff]  }
  0x64   :  { %905 = vmatpush1.bf16.msra.mxu0 %v2839_v46  ;;  %991 = vmatpush1.bf16.msra.mxu1 %v2840_v47  ;;  %v2931_v46 = vld [vmem:[#allocation2 + $0x348] ss:$16 sps:$4 sm:$0xff]   ;;  %v2936_v47 = vld [vmem:[#allocation2 + $0x364] ss:$16 sps:$4 sm:$0xff]  }
  0x65   :  { %906 = vmatprep.subr.bf16.mxu0 %v2841_v49  ;;  %992 = vmatprep.subr.bf16.mxu1 %v2843_v50  ;;  %v2934_v49 = vld [vmem:[#allocation2 + $0x360] ss:$16 sps:$4 sm:$0xff]   ;;  %v2937_v50 = vld [vmem:[#allocation2 + $0x368] ss:$16 sps:$4 sm:$0xff]  }
  0x68   :  { %907 = vmatpush1.bf16.msra.mxu0 %v2845_v51  ;;  %993 = vmatpush1.bf16.msra.mxu1 %v2846_v52  ;;  %v2942_v51 = vld [vmem:[#allocation2 + $0x384] ss:$16 sps:$4 sm:$0xff]   ;;  %v2945_v52 = vld [vmem:[#allocation2 + $0x38c] ss:$16 sps:$4 sm:$0xff]  }
  0x69   :  { %908 = vmatprep.subr.bf16.mxu0 %v2847_v53  ;;  %994 = vmatprep.subr.bf16.mxu1 %v2849_v54  ;;  %v2940_v53 = vld [vmem:[#allocation2 + $0x380] ss:$16 sps:$4 sm:$0xff]   ;;  %v2943_v54 = vld [vmem:[#allocation2 + $0x388] ss:$16 sps:$4 sm:$0xff]  }
  0x6c   :  { %909 = vmatpush1.bf16.msra.mxu0 %v2851_v55  ;;  %995 = vmatpush1.bf16.msra.mxu1 %v2852_v56  ;;  %v2948_v55 = vld [vmem:[#allocation2 + $0x3a4] ss:$16 sps:$4 sm:$0xff]   ;;  %v2951_v56 = vld [vmem:[#allocation2 + $0x3ac] ss:$16 sps:$4 sm:$0xff]  }
  0x6d   :  { %910 = vmatprep.subr.bf16.mxu0 %v2853_v57  ;;  %996 = vmatprep.subr.bf16.mxu1 %v2855_v58  ;;  %v2946_v57 = vld [vmem:[#allocation2 + $0x3a0] ss:$16 sps:$4 sm:$0xff]   ;;  %v2949_v58 = vld [vmem:[#allocation2 + $0x3a8] ss:$16 sps:$4 sm:$0xff]  }
  0x70   :  { %911 = vmatpush1.bf16.msra.mxu0 %v2857_v59  ;;  %997 = vmatpush1.bf16.msra.mxu1 %v2858_v60  ;;  %v2954_v59 = vld [vmem:[#allocation2 + $0x3c4] ss:$16 sps:$4 sm:$0xff]   ;;  %v2957_v60 = vld [vmem:[#allocation2 + $0x3cc] ss:$16 sps:$4 sm:$0xff]  }
  0x71   :  { %912 = vmatprep.subr.bf16.mxu0 %v2859_v61  ;;  %998 = vmatprep.subr.bf16.mxu1 %v2861_v62  ;;  %v2952_v61 = vld [vmem:[#allocation2 + $0x3c0] ss:$16 sps:$4 sm:$0xff]   ;;  %v2955_v62 = vld [vmem:[#allocation2 + $0x3c8] ss:$16 sps:$4 sm:$0xff]  }
  0x74   :  { %913 = vmatpush1.bf16.msra.mxu0 %v2863_v63  ;;  %999 = vmatpush1.bf16.msra.mxu1 %v2864_v0  ;;  %v2960_v63 = vld [vmem:[#allocation2 + $0x3e4] ss:$16 sps:$4 sm:$0xff]   ;;  %v2963_v0 = vld [vmem:[#allocation2 + $0x3ec] ss:$16 sps:$4 sm:$0xff]  }
  0x75   :  { %925 = vmatprep.subr.bf16.mxu0 %v2870_v1  ;;  %1011 = vmatprep.subr.bf16.mxu1 %v2873_v2  ;;  %v2958_v1 = vld [vmem:[#allocation2 + $0x3e0] ss:$16 sps:$4 sm:$0xff]   ;;  %v2961_v2 = vld [vmem:[#allocation2 + $0x3e8] ss:$16 sps:$4 sm:$0xff]  }
  0x77   :  { %915 = vmatmul.mubr.bf16.vlgmr.msra.gmra.mrb[0].mxu0 %v2865_v3  ;;  %1001 = vmatmul.mubr.bf16.vlgmr.msra.gmra.mrb[0].mxu1 %v2865_v3  ;;  %v2964_v3 = vld [vmem:[%s3404_s0 + $0x8] ss:$16 sps:$4 sm:$0xff]  }
  0x78   :  { %926 = vmatpush1.bf16.msra.mxu0 %v2868_v4  ;;  %1012 = vmatpush1.bf16.msra.mxu1 %v2871_v5  ;;  %v2969_v4 = vld [vmem:[#allocation4 + $0x4] ss:$16 sps:$4 sm:$0xff]   ;;  %v2972_v5 = vld [vmem:[#allocation4 + $0xc] ss:$16 sps:$4 sm:$0xff]  }
  0x79   :  { %927 = vmatprep.subr.bf16.mxu0 %v2876_v6  ;;  %1013 = vmatprep.subr.bf16.mxu1 %v2879_v7  ;;  %v2967_v6 = vld [vmem:[#allocation4] ss:$16 sps:$4 sm:$0xff]   ;;  %v2970_v7 = vld [vmem:[#allocation4 + $0x8] ss:$16 sps:$4 sm:$0xff]  }
  0x7a   :  { %957 = vmatprep.mubr.bf16.mxu0 %v2966_v30  ;;  %1043 = vmatprep.mubr.bf16.mxu1 %v2966_v30  ;;  %v3003_v30 = vld [vmem:[#allocation4 + $0xc0] ss:$16 sps:$4 sm:$0xff]  }
  0x7c   :  { %928 = vmatpush1.bf16.msra.mxu0 %v2874_v8  ;;  %1014 = vmatpush1.bf16.msra.mxu1 %v2877_v9  ;;  %v2975_v8 = vld [vmem:[#allocation4 + $0x24] ss:$16 sps:$4 sm:$0xff]   ;;  %v2978_v9 = vld [vmem:[#allocation4 + $0x2c] ss:$16 sps:$4 sm:$0xff]  }
  0x7d   :  { %929 = vmatprep.subr.bf16.mxu0 %v2882_v10  ;;  %1015 = vmatprep.subr.bf16.mxu1 %v2885_v11  ;;  %v2973_v10 = vld [vmem:[#allocation4 + $0x20] ss:$16 sps:$4 sm:$0xff]   ;;  %v2976_v11 = vld [vmem:[#allocation4 + $0x28] ss:$16 sps:$4 sm:$0xff]  }
  0x80   :  { %930 = vmatpush1.bf16.msra.mxu0 %v2880_v12  ;;  %1016 = vmatpush1.bf16.msra.mxu1 %v2883_v13  ;;  %v2981_v12 = vld [vmem:[#allocation4 + $0x44] ss:$16 sps:$4 sm:$0xff]   ;;  %v2984_v13 = vld [vmem:[#allocation4 + $0x4c] ss:$16 sps:$4 sm:$0xff]  }
  0x81   :  { %931 = vmatprep.subr.bf16.mxu0 %v2888_v14  ;;  %1017 = vmatprep.subr.bf16.mxu1 %v2891_v15  ;;  %v2979_v14 = vld [vmem:[#allocation4 + $0x40] ss:$16 sps:$4 sm:$0xff]   ;;  %v2982_v15 = vld [vmem:[#allocation4 + $0x48] ss:$16 sps:$4 sm:$0xff]  }
  0x84   :  { %932 = vmatpush1.bf16.msra.mxu0 %v2886_v16  ;;  %1018 = vmatpush1.bf16.msra.mxu1 %v2889_v17  ;;  %v2987_v16 = vld [vmem:[#allocation4 + $0x64] ss:$16 sps:$4 sm:$0xff]   ;;  %v2990_v17 = vld [vmem:[#allocation4 + $0x6c] ss:$16 sps:$4 sm:$0xff]  }
  0x85   :  { %933 = vmatprep.subr.bf16.mxu0 %v2894_v18  ;;  %1019 = vmatprep.subr.bf16.mxu1 %v2897_v19  ;;  %v2985_v18 = vld [vmem:[#allocation4 + $0x60] ss:$16 sps:$4 sm:$0xff]   ;;  %v2988_v19 = vld [vmem:[#allocation4 + $0x68] ss:$16 sps:$4 sm:$0xff]  }
  0x88   :  { %934 = vmatpush1.bf16.msra.mxu0 %v2892_v20  ;;  %1020 = vmatpush1.bf16.msra.mxu1 %v2895_v21  ;;  %v2993_v20 = vld [vmem:[#allocation4 + $0x84] ss:$16 sps:$4 sm:$0xff]   ;;  %v2996_v21 = vld [vmem:[#allocation4 + $0x8c] ss:$16 sps:$4 sm:$0xff]  }
  0x89   :  { %935 = vmatprep.subr.bf16.mxu0 %v2900_v22  ;;  %1021 = vmatprep.subr.bf16.mxu1 %v2903_v23  ;;  %v2991_v22 = vld [vmem:[#allocation4 + $0x80] ss:$16 sps:$4 sm:$0xff]   ;;  %v2994_v23 = vld [vmem:[#allocation4 + $0x88] ss:$16 sps:$4 sm:$0xff]  }
  0x8c   :  { %936 = vmatpush1.bf16.msra.mxu0 %v2898_v24  ;;  %1022 = vmatpush1.bf16.msra.mxu1 %v2901_v25  ;;  %v2999_v24 = vld [vmem:[#allocation4 + $0xa4] ss:$16 sps:$4 sm:$0xff]   ;;  %v3002_v25 = vld [vmem:[#allocation4 + $0xac] ss:$16 sps:$4 sm:$0xff]  }
  0x8d   :  { %937 = vmatprep.subr.bf16.mxu0 %v2906_v26  ;;  %1023 = vmatprep.subr.bf16.mxu1 %v2909_v27  ;;  %v2997_v26 = vld [vmem:[#allocation4 + $0xa0] ss:$16 sps:$4 sm:$0xff]   ;;  %v3000_v27 = vld [vmem:[#allocation4 + $0xa8] ss:$16 sps:$4 sm:$0xff]  }
  0x90   :  { %938 = vmatpush1.bf16.msra.mxu0 %v2904_v28  ;;  %1024 = vmatpush1.bf16.msra.mxu1 %v2907_v29  ;;  %v3005_v28 = vld [vmem:[#allocation4 + $0xc4] ss:$16 sps:$4 sm:$0xff]   ;;  %v3008_v29 = vld [vmem:[#allocation4 + $0xcc] ss:$16 sps:$4 sm:$0xff]  }
  0x91   :  { %939 = vmatprep.subr.bf16.mxu0 %v2912_v31  ;;  %1025 = vmatprep.subr.bf16.mxu1 %v2915_v32  ;;  %v3006_v31 = vld [vmem:[#allocation4 + $0xc8] ss:$16 sps:$4 sm:$0xff]   ;;  %v3011_v32 = vld [vmem:[#allocation4 + $0xe4] ss:$16 sps:$4 sm:$0xff]  }
  0x94   :  { %940 = vmatpush1.bf16.msra.mxu0 %v2910_v33  ;;  %1026 = vmatpush1.bf16.msra.mxu1 %v2913_v34  ;;  %v3014_v33 = vld [vmem:[#allocation4 + $0xec] ss:$16 sps:$4 sm:$0xff]   ;;  %v3009_v34 = vld [vmem:[#allocation4 + $0xe0] ss:$16 sps:$4 sm:$0xff]  }
  0x95   :  { %941 = vmatprep.subr.bf16.mxu0 %v2918_v35  ;;  %1027 = vmatprep.subr.bf16.mxu1 %v2921_v36  ;;  %v3012_v35 = vld [vmem:[#allocation4 + $0xe8] ss:$16 sps:$4 sm:$0xff]   ;;  %v3017_v36 = vld [vmem:[#allocation4 + $0x104] ss:$16 sps:$4 sm:$0xff]  }
  0x98   :  { %942 = vmatpush1.bf16.msra.mxu0 %v2916_v37  ;;  %1028 = vmatpush1.bf16.msra.mxu1 %v2919_v38  ;;  %v3020_v37 = vld [vmem:[#allocation4 + $0x10c] ss:$16 sps:$4 sm:$0xff]   ;;  %v3015_v38 = vld [vmem:[#allocation4 + $0x100] ss:$16 sps:$4 sm:$0xff]  }
  0x99   :  { %943 = vmatprep.subr.bf16.mxu0 %v2924_v39  ;;  %1029 = vmatprep.subr.bf16.mxu1 %v2927_v40  ;;  %v3018_v39 = vld [vmem:[#allocation4 + $0x108] ss:$16 sps:$4 sm:$0xff]   ;;  %v3023_v40 = vld [vmem:[#allocation4 + $0x124] ss:$16 sps:$4 sm:$0xff]  }
  0x9c   :  { %944 = vmatpush1.bf16.msra.mxu0 %v2922_v41  ;;  %1030 = vmatpush1.bf16.msra.mxu1 %v2925_v42  ;;  %v3026_v41 = vld [vmem:[#allocation4 + $0x12c] ss:$16 sps:$4 sm:$0xff]   ;;  %v3021_v42 = vld [vmem:[#allocation4 + $0x120] ss:$16 sps:$4 sm:$0xff]  }
  0x9d   :  { %945 = vmatprep.subr.bf16.mxu0 %v2930_v43  ;;  %1031 = vmatprep.subr.bf16.mxu1 %v2933_v44  ;;  %v3024_v43 = vld [vmem:[#allocation4 + $0x128] ss:$16 sps:$4 sm:$0xff]   ;;  %v3029_v44 = vld [vmem:[#allocation4 + $0x144] ss:$16 sps:$4 sm:$0xff]  }
  0xa0   :  { %946 = vmatpush1.bf16.msra.mxu0 %v2928_v45  ;;  %1032 = vmatpush1.bf16.msra.mxu1 %v2931_v46  ;;  %v3032_v45 = vld [vmem:[#allocation4 + $0x14c] ss:$16 sps:$4 sm:$0xff]   ;;  %v3027_v46 = vld [vmem:[#allocation4 + $0x140] ss:$16 sps:$4 sm:$0xff]  }
  0xa1   :  { %947 = vmatprep.subr.bf16.mxu0 %v2936_v47  ;;  %1033 = vmatprep.subr.bf16.mxu1 %v2939_v48  ;;  %v3030_v47 = vld [vmem:[#allocation4 + $0x148] ss:$16 sps:$4 sm:$0xff]   ;;  %v3035_v48 = vld [vmem:[#allocation4 + $0x164] ss:$16 sps:$4 sm:$0xff]  }
  0xa4   :  { %948 = vmatpush1.bf16.msra.mxu0 %v2934_v49  ;;  %1034 = vmatpush1.bf16.msra.mxu1 %v2937_v50  ;;  %v3038_v49 = vld [vmem:[#allocation4 + $0x16c] ss:$16 sps:$4 sm:$0xff]   ;;  %v3033_v50 = vld [vmem:[#allocation4 + $0x160] ss:$16 sps:$4 sm:$0xff]  }
  0xa5   :  { %949 = vmatprep.subr.bf16.mxu0 %v2942_v51  ;;  %1035 = vmatprep.subr.bf16.mxu1 %v2945_v52  ;;  %v3036_v51 = vld [vmem:[#allocation4 + $0x168] ss:$16 sps:$4 sm:$0xff]   ;;  %v3041_v52 = vld [vmem:[#allocation4 + $0x184] ss:$16 sps:$4 sm:$0xff]  }
  0xa8   :  { %950 = vmatpush1.bf16.msra.mxu0 %v2940_v53  ;;  %1036 = vmatpush1.bf16.msra.mxu1 %v2943_v54  ;;  %v3044_v53 = vld [vmem:[#allocation4 + $0x18c] ss:$16 sps:$4 sm:$0xff]   ;;  %v3039_v54 = vld [vmem:[#allocation4 + $0x180] ss:$16 sps:$4 sm:$0xff]  }
  0xa9   :  { %951 = vmatprep.subr.bf16.mxu0 %v2948_v55  ;;  %1037 = vmatprep.subr.bf16.mxu1 %v2951_v56  ;;  %v3042_v55 = vld [vmem:[#allocation4 + $0x188] ss:$16 sps:$4 sm:$0xff]   ;;  %v3047_v56 = vld [vmem:[#allocation4 + $0x1a4] ss:$16 sps:$4 sm:$0xff]  }
  0xac   :  { %952 = vmatpush1.bf16.msra.mxu0 %v2946_v57  ;;  %1038 = vmatpush1.bf16.msra.mxu1 %v2949_v58  ;;  %v3050_v57 = vld [vmem:[#allocation4 + $0x1ac] ss:$16 sps:$4 sm:$0xff]   ;;  %v3045_v58 = vld [vmem:[#allocation4 + $0x1a0] ss:$16 sps:$4 sm:$0xff]  }
  0xad   :  { %953 = vmatprep.subr.bf16.mxu0 %v2954_v59  ;;  %1039 = vmatprep.subr.bf16.mxu1 %v2957_v60  ;;  %v3048_v59 = vld [vmem:[#allocation4 + $0x1a8] ss:$16 sps:$4 sm:$0xff]   ;;  %v3053_v60 = vld [vmem:[#allocation4 + $0x1c4] ss:$16 sps:$4 sm:$0xff]  }
  0xb0   :  { %954 = vmatpush1.bf16.msra.mxu0 %v2952_v61  ;;  %1040 = vmatpush1.bf16.msra.mxu1 %v2955_v62  ;;  %v3056_v61 = vld [vmem:[#allocation4 + $0x1cc] ss:$16 sps:$4 sm:$0xff]   ;;  %v3051_v62 = vld [vmem:[#allocation4 + $0x1c0] ss:$16 sps:$4 sm:$0xff]  }
  0xb1   :  { %955 = vmatprep.subr.bf16.mxu0 %v2960_v63  ;;  %1041 = vmatprep.subr.bf16.mxu1 %v2963_v0  ;;  %v3054_v63 = vld [vmem:[#allocation4 + $0x1c8] ss:$16 sps:$4 sm:$0xff]   ;;  %v3059_v0 = vld [vmem:[#allocation4 + $0x1e4] ss:$16 sps:$4 sm:$0xff]  }
  0xb4   :  { %956 = vmatpush1.bf16.msra.mxu0 %v2958_v1  ;;  %1042 = vmatpush1.bf16.msra.mxu1 %v2961_v2  ;;  %v3062_v1 = vld [vmem:[#allocation4 + $0x1ec] ss:$16 sps:$4 sm:$0xff]   ;;  %v3057_v2 = vld [vmem:[#allocation4 + $0x1e0] ss:$16 sps:$4 sm:$0xff]  }
  0xb5   :  { %1856 = vmatprep.subr.bf16.mxu0 %v2969_v4  ;;  %1942 = vmatprep.subr.bf16.mxu1 %v2972_v5  ;;  %v3065_v4 = vld [vmem:[#allocation4 + $0x204] ss:$16 sps:$4 sm:$0xff]   ;;  %v3068_v5 = vld [vmem:[#allocation4 + $0x20c] ss:$16 sps:$4 sm:$0xff]  }
  0xb7   :  { %958 = vmatmul.mubr.bf16.vlgmr.msra.gmra.mrb[0].mxu0 %v2964_v3  ;;  %1044 = vmatmul.mubr.bf16.vlgmr.msra.gmra.mrb[0].mxu1 %v2964_v3  ;;  %v3060_v3 = vld [vmem:[#allocation4 + $0x1e8] ss:$16 sps:$4 sm:$0xff]  }
  0xb8   :  { %1857 = vmatpush1.bf16.msra.mxu0 %v2967_v6  ;;  %1943 = vmatpush1.bf16.msra.mxu1 %v2970_v7  ;;  %v202_v6 = vlaneseq }
  0xb9   :  { %1858 = vmatprep.subr.bf16.mxu0 %v2975_v8  ;;  %1944 = vmatprep.subr.bf16.mxu1 %v2978_v9 }
  0xba   :  { %v3363_v7 = vshrl.u32 %v202_v6, 7  ;;  %v3102_v6 = vld [vmem:[#allocation4 + $0x2c8] ss:$16 sps:$4 sm:$0xff]  }
  0xbc   :  { %1859 = vmatpush1.bf16.msra.mxu0 %v2973_v10  ;;  %1945 = vmatpush1.bf16.msra.mxu1 %v2976_v11  ;;  %v204_v8 = vsub.s32 0, %v3363_v7  ;;  %v212_v9 = vsub.s32 2, %v3363_v7  ;;  %v200_v10 = vld [vmem:[%s3406_s2] sm:$0xf]  ;;  %v208_v11 = vsub.s32 1, %v3363_v7 }
  0xbd   :  { %1860 = vmatprep.subr.bf16.mxu0 %v2981_v12  ;;  %1946 = vmatprep.subr.bf16.mxu1 %v2984_v13  ;;  %v216_v12 = vsub.s32 3, %v3363_v7 }
  0xbe   :  { %v205_v13 = vrot.slane %v200_v10, %v204_v8 }
  0xc0   :  { %1861 = vmatpush1.bf16.msra.mxu0 %v2979_v14  ;;  %1947 = vmatpush1.bf16.msra.mxu1 %v2982_v15  ;;  %v213_v14 = vrot.slane %v200_v10, %v212_v9  ;;  %v209_v15 = vrot.slane %v200_v10, %v208_v11 }
  0xc1   :  { %1862 = vmatprep.subr.bf16.mxu0 %v2987_v16  ;;  %1948 = vmatprep.subr.bf16.mxu1 %v2990_v17  ;;  %v217_v16 = vrot.slane %v200_v10, %v216_v12  ;;  %v3107_v10 = vld [vmem:[#allocation4 + $0x2e4] ss:$16 sps:$4 sm:$0xff]  }
  0xc4   :  { %1863 = vmatpush1.bf16.msra.mxu0 %v2985_v18  ;;  %1949 = vmatpush1.bf16.msra.mxu1 %v2988_v19 }
  0xc5   :  { %1864 = vmatprep.subr.bf16.mxu0 %v2993_v20  ;;  %1950 = vmatprep.subr.bf16.mxu1 %v2996_v21 }
  0xc8   :  { %1865 = vmatpush1.bf16.msra.mxu0 %v2991_v22  ;;  %1951 = vmatpush1.bf16.msra.mxu1 %v2994_v23 }
  0xc9   :  { %1866 = vmatprep.subr.bf16.mxu0 %v2999_v24  ;;  %1952 = vmatprep.subr.bf16.mxu1 %v3002_v25 }
  0xcc   :  { %1867 = vmatpush1.bf16.msra.mxu0 %v2997_v26  ;;  %1953 = vmatpush1.bf16.msra.mxu1 %v3000_v27 }
  0xcd   :  { %1868 = vmatprep.subr.bf16.mxu0 %v3005_v28  ;;  %1954 = vmatprep.subr.bf16.mxu1 %v3008_v29 }
  0xd0   :  { %1869 = vmatpush1.bf16.msra.mxu0 %v3003_v30  ;;  %1955 = vmatpush1.bf16.msra.mxu1 %v3006_v31 }
  0xd1   :  { %1870 = vmatprep.subr.bf16.mxu0 %v3011_v32  ;;  %1956 = vmatprep.subr.bf16.mxu1 %v3014_v33 }
  0xd4   :  { %1871 = vmatpush1.bf16.msra.mxu0 %v3009_v34  ;;  %1957 = vmatpush1.bf16.msra.mxu1 %v3012_v35 }
  0xd5   :  { %1872 = vmatprep.subr.bf16.mxu0 %v3017_v36  ;;  %1958 = vmatprep.subr.bf16.mxu1 %v3020_v37 }
  0xd8   :  { %1873 = vmatpush1.bf16.msra.mxu0 %v3015_v38  ;;  %1959 = vmatpush1.bf16.msra.mxu1 %v3018_v39 }
  0xd9   :  { %1874 = vmatprep.subr.bf16.mxu0 %v3023_v40  ;;  %1960 = vmatprep.subr.bf16.mxu1 %v3026_v41 }
  0xdc   :  { %1875 = vmatpush1.bf16.msra.mxu0 %v3021_v42  ;;  %1961 = vmatpush1.bf16.msra.mxu1 %v3024_v43 }
  0xdd   :  { %1876 = vmatprep.subr.bf16.mxu0 %v3029_v44  ;;  %1962 = vmatprep.subr.bf16.mxu1 %v3032_v45  ;;  %v3063_v45 = vld [vmem:[#allocation4 + $0x200] ss:$16 sps:$4 sm:$0xff]  }
  0xe0   :  { %1877 = vmatpush1.bf16.msra.mxu0 %v3027_v46  ;;  %1963 = vmatpush1.bf16.msra.mxu1 %v3030_v47  ;;  %v3066_v46 = vld [vmem:[#allocation4 + $0x208] ss:$16 sps:$4 sm:$0xff]   ;;  %v3071_v47 = vld [vmem:[#allocation4 + $0x224] ss:$16 sps:$4 sm:$0xff]  }
  0xe1   :  { %1878 = vmatprep.subr.bf16.mxu0 %v3035_v48  ;;  %1964 = vmatprep.subr.bf16.mxu1 %v3038_v49  ;;  %v3074_v48 = vld [vmem:[#allocation4 + $0x22c] ss:$16 sps:$4 sm:$0xff]   ;;  %v3069_v49 = vld [vmem:[#allocation4 + $0x220] ss:$16 sps:$4 sm:$0xff]  }
  0xe4   :  { %1879 = vmatpush1.bf16.msra.mxu0 %v3033_v50  ;;  %1965 = vmatpush1.bf16.msra.mxu1 %v3036_v51  ;;  %v3072_v50 = vld [vmem:[#allocation4 + $0x228] ss:$16 sps:$4 sm:$0xff]   ;;  %v3077_v51 = vld [vmem:[#allocation4 + $0x244] ss:$16 sps:$4 sm:$0xff]  }
  0xe5   :  { %1880 = vmatprep.subr.bf16.mxu0 %v3041_v52  ;;  %1966 = vmatprep.subr.bf16.mxu1 %v3044_v53  ;;  %v3080_v52 = vld [vmem:[#allocation4 + $0x24c] ss:$16 sps:$4 sm:$0xff]   ;;  %v3075_v53 = vld [vmem:[#allocation4 + $0x240] ss:$16 sps:$4 sm:$0xff]  }
  0xe8   :  { %1881 = vmatpush1.bf16.msra.mxu0 %v3039_v54  ;;  %1967 = vmatpush1.bf16.msra.mxu1 %v3042_v55  ;;  %v3078_v54 = vld [vmem:[#allocation4 + $0x248] ss:$16 sps:$4 sm:$0xff]   ;;  %v3083_v55 = vld [vmem:[#allocation4 + $0x264] ss:$16 sps:$4 sm:$0xff]  }
  0xe9   :  { %1882 = vmatprep.subr.bf16.mxu0 %v3047_v56  ;;  %1968 = vmatprep.subr.bf16.mxu1 %v3050_v57  ;;  %v3086_v56 = vld [vmem:[#allocation4 + $0x26c] ss:$16 sps:$4 sm:$0xff]   ;;  %v3081_v57 = vld [vmem:[#allocation4 + $0x260] ss:$16 sps:$4 sm:$0xff]  }
  0xec   :  { %1883 = vmatpush1.bf16.msra.mxu0 %v3045_v58  ;;  %1969 = vmatpush1.bf16.msra.mxu1 %v3048_v59  ;;  %v3084_v58 = vld [vmem:[#allocation4 + $0x268] ss:$16 sps:$4 sm:$0xff]   ;;  %v3089_v59 = vld [vmem:[#allocation4 + $0x284] ss:$16 sps:$4 sm:$0xff]  }
  0xed   :  { %1884 = vmatprep.subr.bf16.mxu0 %v3053_v60  ;;  %1970 = vmatprep.subr.bf16.mxu1 %v3056_v61  ;;  %v3092_v60 = vld [vmem:[#allocation4 + $0x28c] ss:$16 sps:$4 sm:$0xff]   ;;  %v3087_v61 = vld [vmem:[#allocation4 + $0x280] ss:$16 sps:$4 sm:$0xff]  }
  0xf0   :  { %1885 = vmatpush1.bf16.msra.mxu0 %v3051_v62  ;;  %1971 = vmatpush1.bf16.msra.mxu1 %v3054_v63  ;;  %v3090_v62 = vld [vmem:[#allocation4 + $0x288] ss:$16 sps:$4 sm:$0xff]   ;;  %v3095_v63 = vld [vmem:[#allocation4 + $0x2a4] ss:$16 sps:$4 sm:$0xff]  }
  0xf1   :  { %1886 = vmatprep.subr.bf16.mxu0 %v3059_v0  ;;  %1972 = vmatprep.subr.bf16.mxu1 %v3062_v1  ;;  %v3098_v0 = vld [vmem:[#allocation4 + $0x2ac] ss:$16 sps:$4 sm:$0xff]   ;;  %v3093_v1 = vld [vmem:[#allocation4 + $0x2a0] ss:$16 sps:$4 sm:$0xff]  }
  0xf4   :  { %1887 = vmatpush1.bf16.msra.mxu0 %v3057_v2  ;;  %1973 = vmatpush1.bf16.msra.mxu1 %v3060_v3  ;;  %v3096_v2 = vld [vmem:[#allocation4 + $0x2a8] ss:$16 sps:$4 sm:$0xff]   ;;  %v3101_v3 = vld [vmem:[#allocation4 + $0x2c4] ss:$16 sps:$4 sm:$0xff]  }
  0xf5   :  { %1899 = vmatprep.subr.bf16.mxu0 %v3065_v4  ;;  %1985 = vmatprep.subr.bf16.mxu1 %v3068_v5  ;;  %v3104_v4 = vld [vmem:[#allocation4 + $0x2cc] ss:$16 sps:$4 sm:$0xff]   ;;  %v3099_v5 = vld [vmem:[#allocation4 + $0x2c0] ss:$16 sps:$4 sm:$0xff]  }
 0x18a   :  { %v959_v17 = vpop.f32.mrb[0].mxu0  ;;  %v1045_v18 = vpop.f32.mrb[0].mxu1 }
 0x18b   :  { %v2730_v19 = vadd.f32 %v959_v17, %v205_v13  ;;  %v2734_v20 = vadd.f32 %v1045_v18, %v213_v14  ;;  %v961_v21 = vpop.f32.mrb[1].mxu0  ;;  %v1047_v22 = vpop.f32.mrb[1].mxu1  ;;  %v3116_v17 = vld [vmem:[#allocation4 + $0x30c] ss:$16 sps:$4 sm:$0xff]   ;;  %v3111_v18 = vld [vmem:[#allocation4 + $0x300] ss:$16 sps:$4 sm:$0xff]  }
 0x18c   :  { %v2731_v23 = vadd.f32 %v961_v21, %v209_v15  ;;  %v2735_v24 = vadd.f32 %v1047_v22, %v217_v16  ;;  %v963_v25 = vpop.f32.mrb[2].mxu0  ;;  %v1049_v26 = vpop.f32.mrb[2].mxu1  ;;  %v3122_v21 = vld [vmem:[#allocation4 + $0x32c] ss:$16 sps:$4 sm:$0xff]   ;;  %v3117_v22 = vld [vmem:[#allocation4 + $0x320] ss:$16 sps:$4 sm:$0xff]  }
 0x18d   :  { %v2732_v27 = vadd.f32 %v963_v25, %v205_v13  ;;  %v2736_v28 = vadd.f32 %v1049_v26, %v213_v14  ;;  %v965_v29 = vpop.f32.mrb[3].mxu0  ;;  %v1051_v30 = vpop.f32.mrb[3].mxu1  ;;  %v1054_v33 = vmax.f32 %v2730_v19, 0.0  ;;  %v1056_v34 = vmax.f32 %v2734_v20, 0.0  ;;  %v3110_v13 = vld [vmem:[#allocation4 + $0x2ec] ss:$16 sps:$4 sm:$0xff]  }
 0x18e   :  { %v2733_v31 = vadd.f32 %v965_v29, %v209_v15  ;;  %v2737_v32 = vadd.f32 %v1051_v30, %v217_v16  ;;  %v1055_v37 = vmax.f32 %v2731_v23, 0.0  ;;  %v1057_v38 = vmax.f32 %v2735_v24, 0.0  ;;  %v3105_v14 = vld [vmem:[#allocation4 + $0x2e0] ss:$16 sps:$4 sm:$0xff]   ;;  %v3108_v15 = vld [vmem:[#allocation4 + $0x2e8] ss:$16 sps:$4 sm:$0xff]  }
 0x18f   :  { %v1058_v35 = vmax.f32 %v2732_v27, 0.0  ;;  %v1060_v36 = vmax.f32 %v2736_v28, 0.0  ;;  %v3113_v16 = vld [vmem:[#allocation4 + $0x304] ss:$16 sps:$4 sm:$0xff]   ;;  %v3114_v19 = vld [vmem:[#allocation4 + $0x308] ss:$16 sps:$4 sm:$0xff]  }
 0x190   :  { %v1059_v39 = vmax.f32 %v2733_v31, 0.0  ;;  %v1061_v40 = vmax.f32 %v2737_v32, 0.0  ;;  %v3119_v20 = vld [vmem:[#allocation4 + $0x324] ss:$16 sps:$4 sm:$0xff]   ;;  %v3120_v23 = vld [vmem:[#allocation4 + $0x328] ss:$16 sps:$4 sm:$0xff]  }
 0x191   :  { %v1062_v41 = vpack.c.bf16 %v1058_v35, %v1054_v33  ;;  %v3380_v42 = vpack.c.bf16 %v1060_v36, %v1056_v34  ;;  %v3125_v24 = vld [vmem:[#allocation4 + $0x344] ss:$16 sps:$4 sm:$0xff]   ;;  %v3128_v25 = vld [vmem:[#allocation4 + $0x34c] ss:$16 sps:$4 sm:$0xff]   ;;  %v3123_v26 = vld [vmem:[#allocation4 + $0x340] ss:$16 sps:$4 sm:$0xff]  }
 0x192   :  { %v1063_v43 = vpack.c.bf16 %v1059_v39, %v1055_v37  ;;  %v1065_v44 = vpack.c.bf16 %v1061_v40, %v1057_v38  ;;  %v3126_v27 = vld [vmem:[#allocation4 + $0x348] ss:$16 sps:$4 sm:$0xff]   ;;  %v3131_v28 = vld [vmem:[#allocation4 + $0x364] ss:$16 sps:$4 sm:$0xff]   ;;  %v3134_v29 = vld [vmem:[#allocation4 + $0x36c] ss:$16 sps:$4 sm:$0xff]  }
 0x193   :  { %v3129_v30 = vld [vmem:[#allocation4 + $0x360] ss:$16 sps:$4 sm:$0xff]   ;;  %v3132_v31 = vld [vmem:[#allocation4 + $0x368] ss:$16 sps:$4 sm:$0xff]   ;;  %v3137_v32 = vld [vmem:[#allocation4 + $0x384] ss:$16 sps:$4 sm:$0xff]  }
 0x194   :  { %1888 = vmatprep.mubr.bf16.mxu0 %v1063_v43  ;;  %1974 = vmatprep.mubr.bf16.mxu1 %v1063_v43  ;;  %v3140_v33 = vld [vmem:[#allocation4 + $0x38c] ss:$16 sps:$4 sm:$0xff]   ;;  %v3135_v34 = vld [vmem:[#allocation4 + $0x380] ss:$16 sps:$4 sm:$0xff]   ;;  %v3138_v35 = vld [vmem:[#allocation4 + $0x388] ss:$16 sps:$4 sm:$0xff]  }
 0x195   :  { %1889 = vmatmul.mubr.bf16.vlgmr.msra.gmra.mrb[4].mxu0 %v1062_v41  ;;  %1975 = vmatmul.mubr.bf16.vlgmr.msra.gmra.mrb[4].mxu1 %v1062_v41  ;;  %v3143_v36 = vld [vmem:[#allocation4 + $0x3a4] ss:$16 sps:$4 sm:$0xff]   ;;  %v3146_v37 = vld [vmem:[#allocation4 + $0x3ac] ss:$16 sps:$4 sm:$0xff]   ;;  %v3141_v38 = vld [vmem:[#allocation4 + $0x3a0] ss:$16 sps:$4 sm:$0xff]  }
 0x196   :  { %1900 = vmatpush1.bf16.msra.mxu0 %v3063_v45  ;;  %1986 = vmatpush1.bf16.msra.mxu1 %v3066_v46  ;;  %v3144_v39 = vld [vmem:[#allocation4 + $0x3a8] ss:$16 sps:$4 sm:$0xff]   ;;  %v3149_v40 = vld [vmem:[#allocation4 + $0x3c4] ss:$16 sps:$4 sm:$0xff]   ;;  %v3152_v41 = vld [vmem:[#allocation4 + $0x3cc] ss:$16 sps:$4 sm:$0xff]  }
 0x197   :  { %1931 = vmatprep.mubr.bf16.mxu0 %v1065_v44  ;;  %2017 = vmatprep.mubr.bf16.mxu1 %v1065_v44  ;;  %v3147_v43 = vld [vmem:[#allocation4 + $0x3c0] ss:$16 sps:$4 sm:$0xff]   ;;  %v3150_v44 = vld [vmem:[#allocation4 + $0x3c8] ss:$16 sps:$4 sm:$0xff]   ;;  %v3155_v45 = vld [vmem:[#allocation4 + $0x3e4] ss:$16 sps:$4 sm:$0xff]  }
 0x198   :  { %1901 = vmatprep.subr.bf16.mxu0 %v3071_v47  ;;  %1987 = vmatprep.subr.bf16.mxu1 %v3074_v48  ;;  %v3158_v46 = vld [vmem:[#allocation4 + $0x3ec] ss:$16 sps:$4 sm:$0xff]   ;;  %v3153_v47 = vld [vmem:[#allocation4 + $0x3e0] ss:$16 sps:$4 sm:$0xff]   ;;  %v3156_v48 = vld [vmem:[#allocation4 + $0x3e8] ss:$16 sps:$4 sm:$0xff]  }
 0x19a   :  { %1902 = vmatpush1.bf16.msra.mxu0 %v3069_v49  ;;  %1988 = vmatpush1.bf16.msra.mxu1 %v3072_v50  ;;  %v3159_v49 = vld [vmem:[#allocation6 + $0x40] sm:$0xff]  }
 0x19b   :  { %1903 = vmatprep.subr.bf16.mxu0 %v3077_v51  ;;  %1989 = vmatprep.subr.bf16.mxu1 %v3080_v52  ;;  %v3160_v50 = vld [vmem:[#allocation6 + $0xc0] sm:$0xff]  }
 0x19c   :  { %v3161_v51 = vld [vmem:[#allocation6] sm:$0xff]  }
 0x19d   :  { %v3162_v52 = vld [vmem:[#allocation6 + $0x80] sm:$0xff]  }
 0x19e   :  { %1904 = vmatpush1.bf16.msra.mxu0 %v3075_v53  ;;  %1990 = vmatpush1.bf16.msra.mxu1 %v3078_v54  ;;  %v3163_v53 = vld [vmem:[#allocation6 + $0x48] sm:$0xff]  }
 0x19f   :  { %1905 = vmatprep.subr.bf16.mxu0 %v3083_v55  ;;  %1991 = vmatprep.subr.bf16.mxu1 %v3086_v56  ;;  %v3164_v54 = vld [vmem:[#allocation6 + $0xc8] sm:$0xff]  }
 0x1a0   :  { %v3165_v55 = vld [vmem:[#allocation6 + $0x8] sm:$0xff]  }
 0x1a1   :  { %v3166_v56 = vld [vmem:[#allocation6 + $0x88] sm:$0xff]  }
 0x1a2   :  { %1906 = vmatpush1.bf16.msra.mxu0 %v3081_v57  ;;  %1992 = vmatpush1.bf16.msra.mxu1 %v3084_v58  ;;  %v3167_v57 = vld [vmem:[#allocation6 + $0x50] sm:$0xff]  }
 0x1a3   :  { %1907 = vmatprep.subr.bf16.mxu0 %v3089_v59  ;;  %1993 = vmatprep.subr.bf16.mxu1 %v3092_v60  ;;  %v3168_v58 = vld [vmem:[#allocation6 + $0xd0] sm:$0xff]  }
 0x1a4   :  { %v3169_v59 = vld [vmem:[#allocation6 + $0x10] sm:$0xff]  }
 0x1a5   :  { %v3170_v60 = vld [vmem:[#allocation6 + $0x90] sm:$0xff]  }
 0x1a6   :  { %1908 = vmatpush1.bf16.msra.mxu0 %v3087_v61  ;;  %1994 = vmatpush1.bf16.msra.mxu1 %v3090_v62  ;;  %v3171_v61 = vld [vmem:[#allocation6 + $0x58] sm:$0xff]  }
 0x1a7   :  { %1909 = vmatprep.subr.bf16.mxu0 %v3095_v63  ;;  %1995 = vmatprep.subr.bf16.mxu1 %v3098_v0  ;;  %v3172_v62 = vld [vmem:[#allocation6 + $0xd8] sm:$0xff]   ;;  %v3175_v0 = vld [vmem:[#allocation6 + $0x60] sm:$0xff]  }
 0x1a8   :  { %v3173_v63 = vld [vmem:[#allocation6 + $0x18] sm:$0xff]  }
 0x1aa   :  { %1910 = vmatpush1.bf16.msra.mxu0 %v3093_v1  ;;  %1996 = vmatpush1.bf16.msra.mxu1 %v3096_v2  ;;  %v3176_v1 = vld [vmem:[#allocation6 + $0xe0] sm:$0xff]  }
 0x1ab   :  { %1911 = vmatprep.subr.bf16.mxu0 %v3101_v3  ;;  %1997 = vmatprep.subr.bf16.mxu1 %v3104_v4  ;;  %v3177_v2 = vld [vmem:[#allocation6 + $0x20] sm:$0xff]   ;;  %v3179_v4 = vld [vmem:[#allocation6 + $0x68] sm:$0xff]  }
 0x1ac   :  { %v3178_v3 = vld [vmem:[#allocation6 + $0xa0] sm:$0xff]  }
 0x1ae   :  { %1912 = vmatpush1.bf16.msra.mxu0 %v3099_v5  ;;  %1998 = vmatpush1.bf16.msra.mxu1 %v3102_v6  ;;  %v3180_v5 = vld [vmem:[#allocation6 + $0xe8] sm:$0xff]  }
 0x1af   :  { %1913 = vmatprep.subr.bf16.mxu0 %v3107_v10  ;;  %1999 = vmatprep.subr.bf16.mxu1 %v3110_v13  ;;  %v3181_v6 = vld [vmem:[#allocation6 + $0x28] sm:$0xff]   ;;  %v3183_v13 = vld [vmem:[#allocation6 + $0x70] sm:$0xff]  }
 0x1b0   :  { %v3182_v10 = vld [vmem:[#allocation6 + $0xa8] sm:$0xff]  }
 0x1b2   :  { %1914 = vmatpush1.bf16.msra.mxu0 %v3105_v14  ;;  %2000 = vmatpush1.bf16.msra.mxu1 %v3108_v15  ;;  %v3184_v14 = vld [vmem:[#allocation6 + $0xf0] sm:$0xff]  }
 0x1b3   :  { %1915 = vmatprep.subr.bf16.mxu0 %v3113_v16  ;;  %2001 = vmatprep.subr.bf16.mxu1 %v3116_v17  ;;  %v3185_v15 = vld [vmem:[#allocation6 + $0x30] sm:$0xff]   ;;  %v3187_v17 = vld [vmem:[#allocation6 + $0x78] sm:$0xff]  }
 0x1b4   :  { %v3186_v16 = vld [vmem:[#allocation6 + $0xb0] sm:$0xff]  }
 0x1b6   :  { %1916 = vmatpush1.bf16.msra.mxu0 %v3111_v18  ;;  %2002 = vmatpush1.bf16.msra.mxu1 %v3114_v19  ;;  %v3188_v18 = vld [vmem:[#allocation6 + $0xf8] sm:$0xff]  }
 0x1b7   :  { %1917 = vmatprep.subr.bf16.mxu0 %v3119_v20  ;;  %2003 = vmatprep.subr.bf16.mxu1 %v3122_v21  ;;  %v3189_v19 = vld [vmem:[#allocation6 + $0x38] sm:$0xff]  }
 0x1b8   :  { %v3190_v20 = vld [vmem:[#allocation6 + $0xb8] sm:$0xff]  }
 0x1b9   :  { %v1194_v21 = vld [vmem:[%s3408_s4] sm:$0xf] }
 0x1ba   :  { %1918 = vmatpush1.bf16.msra.mxu0 %v3117_v22  ;;  %2004 = vmatpush1.bf16.msra.mxu1 %v3120_v23  ;;  %v1199_v22 = vrot.slane %v1194_v21, %v204_v8  ;;  %v1207_v23 = vrot.slane %v1194_v21, %v212_v9 }
 0x1bb   :  { %1919 = vmatprep.subr.bf16.mxu0 %v3125_v24  ;;  %2005 = vmatprep.subr.bf16.mxu1 %v3128_v25  ;;  %v1203_v24 = vrot.slane %v1194_v21, %v208_v11  ;;  %v1211_v25 = vrot.slane %v1194_v21, %v216_v12 }
 0x1be   :  { %1920 = vmatpush1.bf16.msra.mxu0 %v3123_v26  ;;  %2006 = vmatpush1.bf16.msra.mxu1 %v3126_v27 }
 0x1bf   :  { %1921 = vmatprep.subr.bf16.mxu0 %v3131_v28  ;;  %2007 = vmatprep.subr.bf16.mxu1 %v3134_v29 }
 0x1c2   :  { %1922 = vmatpush1.bf16.msra.mxu0 %v3129_v30  ;;  %2008 = vmatpush1.bf16.msra.mxu1 %v3132_v31 }
 0x1c3   :  { %1923 = vmatprep.subr.bf16.mxu0 %v3137_v32  ;;  %2009 = vmatprep.subr.bf16.mxu1 %v3140_v33 }
 0x1c6   :  { %1924 = vmatpush1.bf16.msra.mxu0 %v3135_v34  ;;  %2010 = vmatpush1.bf16.msra.mxu1 %v3138_v35 }
 0x1c7   :  { %1925 = vmatprep.subr.bf16.mxu0 %v3143_v36  ;;  %2011 = vmatprep.subr.bf16.mxu1 %v3146_v37 }
 0x1ca   :  { %1926 = vmatpush1.bf16.msra.mxu0 %v3141_v38  ;;  %2012 = vmatpush1.bf16.msra.mxu1 %v3144_v39 }
 0x1cb   :  { %1927 = vmatprep.subr.bf16.mxu0 %v3149_v40  ;;  %2013 = vmatprep.subr.bf16.mxu1 %v3152_v41 }
 0x1ce   :  { %1928 = vmatpush1.bf16.msra.mxu0 %v3147_v43  ;;  %2014 = vmatpush1.bf16.msra.mxu1 %v3150_v44 }
 0x1cf   :  { %1929 = vmatprep.subr.bf16.mxu0 %v3155_v45  ;;  %2015 = vmatprep.subr.bf16.mxu1 %v3158_v46 }
 0x1d2   :  { %1930 = vmatpush1.bf16.msra.mxu0 %v3153_v47  ;;  %2016 = vmatpush1.bf16.msra.mxu1 %v3156_v48 }
 0x1d3   :  { %2686 = vmatprep.subr.bf16.mxu0 %v3159_v49  ;;  %2708 = vmatprep.subr.bf16.mxu1 %v3160_v50 }
 0x1d5   :  { %1932 = vmatmul.mubr.bf16.vlgmr.msra.gmra.mrb[4].mxu0 %v3380_v42  ;;  %2018 = vmatmul.mubr.bf16.vlgmr.msra.gmra.mrb[4].mxu1 %v3380_v42  ;;  %v3174_v42 = vld [vmem:[#allocation6 + $0x98] sm:$0xff]  }
 0x1d6   :  { %2687 = vmatpush3.bf16.msra.mxu0 %v3161_v51  ;;  %2709 = vmatpush3.bf16.msra.mxu1 %v3162_v52  ;;  %v2653_v52 = vld [vmem:[%s3410_s6] ss:$0 sm:$0xff] }
 0x1d7   :  { %2688 = vmatprep.subr.bf16.mxu0 %v3163_v53  ;;  %2710 = vmatprep.subr.bf16.mxu1 %v3164_v54 }
 0x1da   :  { %2689 = vmatpush3.bf16.msra.mxu0 %v3165_v55  ;;  %2711 = vmatpush3.bf16.msra.mxu1 %v3166_v56 }
 0x1db   :  { %2690 = vmatprep.subr.bf16.mxu0 %v3167_v57  ;;  %2712 = vmatprep.subr.bf16.mxu1 %v3168_v58 }
 0x1de   :  { %2691 = vmatpush3.bf16.msra.mxu0 %v3169_v59  ;;  %2713 = vmatpush3.bf16.msra.mxu1 %v3170_v60 }
 0x1df   :  { %2692 = vmatprep.subr.bf16.mxu0 %v3171_v61  ;;  %2714 = vmatprep.subr.bf16.mxu1 %v3172_v62 }
 0x1e2   :  { %2693 = vmatpush3.bf16.msra.mxu0 %v3173_v63  ;;  %2715 = vmatpush3.bf16.msra.mxu1 %v3174_v42 }
 0x1e3   :  { %2694 = vmatprep.subr.bf16.mxu0 %v3175_v0  ;;  %2716 = vmatprep.subr.bf16.mxu1 %v3176_v1 }
 0x1e6   :  { %2695 = vmatpush3.bf16.msra.mxu0 %v3177_v2  ;;  %2717 = vmatpush3.bf16.msra.mxu1 %v3178_v3 }
 0x1e7   :  { %2696 = vmatprep.subr.bf16.mxu0 %v3179_v4  ;;  %2718 = vmatprep.subr.bf16.mxu1 %v3180_v5 }
 0x1ea   :  { %2697 = vmatpush3.bf16.msra.mxu0 %v3181_v6  ;;  %2719 = vmatpush3.bf16.msra.mxu1 %v3182_v10 }
 0x1eb   :  { %2698 = vmatprep.subr.bf16.mxu0 %v3183_v13  ;;  %2720 = vmatprep.subr.bf16.mxu1 %v3184_v14 }
 0x1ee   :  { %2699 = vmatpush3.bf16.msra.mxu0 %v3185_v15  ;;  %2721 = vmatpush3.bf16.msra.mxu1 %v3186_v16 }
 0x1ef   :  { %2700 = vmatprep.subr.bf16.mxu0 %v3187_v17  ;;  %2722 = vmatprep.subr.bf16.mxu1 %v3188_v18 }
 0x1f2   :  { %2701 = vmatpush3.bf16.msra.mxu0 %v3189_v19  ;;  %2723 = vmatpush3.bf16.msra.mxu1 %v3190_v20 }
 0x2a8   :  { %v1933_v26 = vpop.f32.mrb[4].mxu0  ;;  %v2019_v27 = vpop.f32.mrb[4].mxu1 }
 0x2a9   :  { %v2738_v28 = vadd.f32 %v1933_v26, %v1199_v22  ;;  %v2742_v29 = vadd.f32 %v2019_v27, %v1207_v23  ;;  %v1935_v30 = vpop.f32.mrb[5].mxu0  ;;  %v2021_v31 = vpop.f32.mrb[5].mxu1 }
 0x2aa   :  { %v2739_v32 = vadd.f32 %v1935_v30, %v1203_v24  ;;  %v2743_v33 = vadd.f32 %v2021_v31, %v1211_v25  ;;  %v1937_v34 = vpop.f32.mrb[6].mxu0  ;;  %v2023_v35 = vpop.f32.mrb[6].mxu1 }
 0x2ab   :  { %v2740_v8 = vadd.f32 %v1937_v34, %v1199_v22  ;;  %v2744_v36 = vadd.f32 %v2023_v35, %v1207_v23  ;;  %v1939_v37 = vpop.f32.mrb[7].mxu0  ;;  %v2025_v9 = vpop.f32.mrb[7].mxu1  ;;  %v2028_v11 = vmax.f32 %v2738_v28, 0.0  ;;  %v2030_v40 = vmax.f32 %v2742_v29, 0.0 }
 0x2ac   :  { %v2741_v38 = vadd.f32 %v1939_v37, %v1203_v24  ;;  %v2745_v39 = vadd.f32 %v2025_v9, %v1211_v25  ;;  %v2029_v41 = vmax.f32 %v2739_v32, 0.0  ;;  %v2031_v43 = vmax.f32 %v2743_v33, 0.0 }
 0x2ad   :  { %v2032_v7 = vmax.f32 %v2740_v8, 0.0  ;;  %v2034_v12 = vmax.f32 %v2744_v36, 0.0 }
 0x2ae   :  { %v2033_v44 = vmax.f32 %v2741_v38, 0.0  ;;  %v2035_v45 = vmax.f32 %v2745_v39, 0.0 }
 0x2af   :  { %v2036_v46 = vpack.c.bf16 %v2032_v7, %v2028_v11  ;;  %v2038_v47 = vpack.c.bf16 %v2034_v12, %v2030_v40 }
 0x2b0   :  { %v2037_v48 = vpack.c.bf16 %v2033_v44, %v2029_v41  ;;  %v2039_v49 = vpack.c.bf16 %v2035_v45, %v2031_v43 }
 0x2b2   :  { %2335 = vmatprep.mubr.bf16.mxu0 %v2037_v48  ;;  %2376 = vmatprep.mubr.bf16.mxu1 %v2039_v49 }
 0x2b3   :  { %2336 = vmatmul.mubr.bf16.vlgmr.msra.gmra.mrb[8].mxu0 %v2036_v46  ;;  %2377 = vmatmul.mubr.bf16.vlgmr.msra.gmra.mrb[8].mxu1 %v2038_v47 }
 0x386   :  { %v2702_v50 = vpop.f32.mrb[8].mxu0  ;;  %v2724_v51 = vpop.f32.mrb[8].mxu1 }
 0x387   :  { %v2703_v53 = vpop.f32.mrb[9].mxu0  ;;  %v2725_v54 = vpop.f32.mrb[9].mxu1 }
 0x388   :  { %v2704_v55 = vadd.f32 %v2703_v53, %v2702_v50  ;;  %v2726_v56 = vadd.f32 %v2725_v54, %v2724_v51  ;;  %v2705_v57 = vpop.f32.mrb[10].mxu0  ;;  %v2727_v58 = vpop.f32.mrb[10].mxu1 }
 0x389   :  { %v2706_v59 = vpop.f32.mrb[11].mxu0  ;;  %v2728_v60 = vpop.f32.mrb[11].mxu1 }
 0x38a   :  { %v2338_v61 = vadd.f32 %v2704_v55, %v2653_v52  ;;  %v2707_v62 = vadd.f32 %v2706_v59, %v2705_v57  ;;  %v2729_v63 = vadd.f32 %v2728_v60, %v2727_v58 }
 0x38c   :  { %v2379_v42 = vadd.f32 %v2726_v56, %v2338_v61  ;;  %v2341_v0 = vadd.f32 %v2707_v62, %v2653_v52 }
 0x38e   :  { %2385 = vst [vmem:[%s3411_s7] sm:$0xff] %v2379_v42  ;;  %v2382_v1 = vadd.f32 %v2729_v63, %v2341_v0 }
 0x390   :  { %2386 = vst [vmem:[%s3411_s7 + $0x8] sm:$0xff] %v2382_v1 }
 0x391   :  { %2391 = vsyncpa [#allocation3], 1 }
 0x392   :  { %2392 = vsyncpa [#allocation5], 1 }

</bundles_post_ra>
